<compile_context>
chip_gen: v5e
topology: v5e:2x2
jax: 0.10.0
libtpu: 0.0.40
codegen_flags: <defaults>
</compile_context>

<pallas_src>
import functools

import jax
import jax.numpy as jnp
from jax.experimental import pallas as pl
from jax.experimental.pallas import tpu as pltpu


def _round_up(x, m):
    return ((x + m - 1) // m) * m


def _distill_loss_kernel(s_ref, t_ref, y_ref, out_ref, *,
                         alpha, inv_temp, label_smoothing, n_rows, block_rows):
    i = pl.program_id(0)

    # Stream in native dtype; upcast right after load (v5e has no bf16 VPU).
    s = s_ref[...].astype(jnp.float32)        # (TN, C) student logits
    t = t_ref[...].astype(jnp.float32)        # (TN, C) teacher logits
    y = y_ref[...]                            # (TN, 1) int32 labels

    tn, c = s.shape
    eps = label_smoothing

    cls_ids = jax.lax.broadcasted_iota(jnp.int32, (tn, c), 1)

    # ---- hard loss: CE with label smoothing, one fused class reduction ----
    # w[i,c] = 1-eps+eps/C at the label, eps/C elsewhere  (single select).
    w = jnp.where(cls_ids == y, 1.0 - eps + eps / c, eps / c)       # (TN, C)
    m_s = jnp.max(s, axis=-1, keepdims=True)
    lse_s = m_s + jnp.log(jnp.sum(jnp.exp(s - m_s), axis=-1, keepdims=True))
    hard = lse_s - jnp.sum(s * w, axis=-1, keepdims=True)           # (TN, 1)

    # ---- soft loss: KL(softmax(t/T) || softmax(s/T)), per row ----
    sT = s * inv_temp
    tT = t * inv_temp
    m_sT = m_s * inv_temp                     # reuse untempered max (1/T > 0)
    lse_sT = m_sT + jnp.log(jnp.sum(jnp.exp(sT - m_sT), axis=-1, keepdims=True))
    m_tT = jnp.max(tT, axis=-1, keepdims=True)
    e_tT = jnp.exp(tT - m_tT)
    z_tT = jnp.sum(e_tT, axis=-1, keepdims=True)
    lse_tT = m_tT + jnp.log(z_tT)
    # sum_c p_t*(tT - sT) = (1/z_tT) * sum_c e_tT*(tT - sT); per-row divide only.
    r = jnp.sum(e_tT * (tT - sT), axis=-1, keepdims=True)
    soft = r / z_tT - lse_tT + lse_sT                                # (TN, 1)

    combined = alpha * hard + (1.0 - alpha) * soft                   # (TN, 1)

    # Mask rows beyond N (last, partially filled tile). select, so NaN/inf in
    # padded rows cannot leak into the sum (do NOT replace with multiply).
    row_ids = i * block_rows + jax.lax.broadcasted_iota(jnp.int32, (tn, 1), 0)
    combined = jnp.where(row_ids < n_rows, combined, 0.0)

    partial = jnp.sum(combined)                                      # scalar
    # Per-grid-step lane-dense partial tile (unmasked store, no shared
    # accumulator -> safe under a "parallel" grid axis / megacore).
    out_ref[...] = jnp.zeros_like(out_ref) + partial


def distillation_loss(student_logits, teacher_logits, labels, *,
                      alpha=0.5, temperature=3.0, label_smoothing=0.1,
                      max_block_rows=1024, vmem_budget_bytes=24 * 1024 * 1024):
    """Pallas-backed DistillationLoss forward. Returns a scalar."""
    n, c = student_logits.shape
    assert teacher_logits.shape == (n, c)
    labels2d = labels.astype(jnp.int32).reshape(n, 1)

    s_item = jnp.dtype(student_logits.dtype).itemsize
    t_item = jnp.dtype(teacher_logits.dtype).itemsize
    # Honest per-tile-row working set: 2 input streams x 2 pipeline buffers in
    # native dtype + ~6 live (TN, C) float32 temps inside the kernel.
    per_row_bytes = 2 * c * s_item + 2 * c * t_item + 6 * c * 4
    tn_budget = max(8, vmem_budget_bytes // max(1, per_row_bytes))
    tn = min(max_block_rows, _round_up(n, 8), tn_budget)
    tn = max(8, (tn // 8) * 8)
    nblocks = pl.cdiv(n, tn)

    # Scoped-VMEM limit sized to the real working set + headroom; capped at
    # 48 MiB so it also fits v7x's 64 MiB physical VMEM.
    vmem_limit = int(min(48 * 1024 * 1024,
                         max(32 * 1024 * 1024,
                             tn * per_row_bytes + (8 << 20))))

    kernel = functools.partial(
        _distill_loss_kernel,
        alpha=float(alpha),
        inv_temp=float(1.0 / temperature),
        label_smoothing=float(label_smoothing),
        n_rows=n,
        block_rows=tn,
    )

    bytes_accessed = int(n * c * s_item + n * c * t_item + n * 4
                         + nblocks * 8 * 128 * 4)
    cost = pl.CostEstimate(
        flops=int(12 * n * c),
        transcendentals=int(3 * n * c),
        bytes_accessed=bytes_accessed,
    )

    partials = pl.pallas_call(
        kernel,
        out_shape=jax.ShapeDtypeStruct((nblocks, 8, 128), jnp.float32),
        grid=(nblocks,),
        in_specs=[
            pl.BlockSpec((tn, c), lambda i: (i, 0)),   # student logits
            pl.BlockSpec((tn, c), lambda i: (i, 0)),   # teacher logits
            pl.BlockSpec((tn, 1), lambda i: (i, 0)),   # labels
        ],
        # One private, lane-dense (8,128) partial tile per grid step: no shared
        # resident block, so the axis can be sharded across both v7x cores.
        out_specs=pl.BlockSpec((1, 8, 128), lambda i: (i, 0, 0)),
        compiler_params=pltpu.CompilerParams(
            dimension_semantics=("parallel",),
            vmem_limit_bytes=vmem_limit,
        ),
        cost_estimate=cost,
    )(student_logits, teacher_logits, labels2d)

    # Tiny (nblocks,) reduction in JAX; both 'mean' and 'batchmean' divide by N.
    return jnp.sum(partials[:, 0, 0]) / n


def _ref_distillation_loss(student_logits, teacher_logits, labels,
                           alpha=0.5, temperature=3.0, label_smoothing=0.1):
    """Pure-JAX reference mirroring the PyTorch module."""
    s = student_logits.astype(jnp.float32)
    t = teacher_logits.astype(jnp.float32)
    n, c = s.shape
    log_q = jax.nn.log_softmax(s / temperature, axis=1)
    p = jax.nn.softmax(t / temperature, axis=1)
    soft = jnp.sum(p * (jnp.log(p) - log_q)) / n                    # batchmean
    logp = jax.nn.log_softmax(s, axis=1)
    nll = -jnp.take_along_axis(logp, labels[:, None].astype(jnp.int32), axis=-1)[:, 0]
    smooth = -jnp.mean(logp, axis=-1)
    hard = jnp.mean((1.0 - label_smoothing) * nll + label_smoothing * smooth)
    return alpha * hard + (1.0 - alpha) * soft


if __name__ == "__main__":
    key = jax.random.PRNGKey(0)
    k_s, k_t, k_y, k_s2, k_t2, k_y2 = jax.random.split(key, 6)

    # Case 1: f32, shapes divide the tile evenly.
    n1, c1 = 16, 32
    s1 = jax.random.normal(k_s, (n1, c1), dtype=jnp.float32)
    t1 = jax.random.normal(k_t, (n1, c1), dtype=jnp.float32)
    y1 = jax.random.randint(k_y, (n1,), 0, c1, dtype=jnp.int32)

    loss1 = jax.block_until_ready(
        distillation_loss(s1, t1, y1, alpha=0.5, temperature=3.0, label_smoothing=0.1))
    ref1 = _ref_distillation_loss(s1, t1, y1, alpha=0.5, temperature=3.0, label_smoothing=0.1)
    assert jnp.allclose(loss1, ref1, atol=1e-5, rtol=1e-5), (loss1, ref1)

    # Case 2: bf16 inputs, ragged N (exercises the row-mask on the last tile).
    n2, c2 = 20, 24
    s2 = jax.random.normal(k_s2, (n2, c2), dtype=jnp.float32).astype(jnp.bfloat16)
    t2 = jax.random.normal(k_t2, (n2, c2), dtype=jnp.float32).astype(jnp.bfloat16)
    y2 = jax.random.randint(k_y2, (n2,), 0, c2, dtype=jnp.int32)

    loss2 = jax.block_until_ready(
        distillation_loss(s2, t2, y2, alpha=0.3, temperature=2.0, label_smoothing=0.05))
    ref2 = _ref_distillation_loss(s2, t2, y2, alpha=0.3, temperature=2.0, label_smoothing=0.05)
    assert jnp.allclose(loss2, ref2, atol=1e-4, rtol=1e-4), (loss2, ref2)

    print("KERNEL_OK")
</pallas_src>

<mosaic_0001>
module attributes {stable_mosaic.version = 11 : i64} {
  func.func @_distill_loss_kernel(%arg0: i32, %arg1: memref<16x32xf32, #tpu.memory_space<vmem>>, %arg2: memref<16x32xf32, #tpu.memory_space<vmem>>, %arg3: memref<16x1xi32, #tpu.memory_space<vmem>>, %arg4: memref<1x8x128xf32, #tpu.memory_space<vmem>>) attributes {dimension_semantics = [#tpu.dimension_semantics<parallel>], iteration_bounds = array<i64: 1>, scalar_prefetch = 0 : i64, scratch_operands = 0 : i64, tpu.core_type = #tpu.core_type<tc>, window_params = [{transform_indices = @transform_0, window_bounds = array<i64: 16, 32>}, {transform_indices = @transform_1, window_bounds = array<i64: 16, 32>}, {transform_indices = @transform_2, window_bounds = array<i64: 16, 1>}, {transform_indices = @transform_3, window_bounds = array<i64: 1, 8, 128>}]} {
    %c0 = arith.constant 0 : index
    %c0_0 = arith.constant 0 : index
    %0 = vector.load %arg1[%c0, %c0_0] : memref<16x32xf32, #tpu.memory_space<vmem>>, vector<16x32xf32>
    %c0_1 = arith.constant 0 : index
    %c0_2 = arith.constant 0 : index
    %1 = vector.load %arg2[%c0_1, %c0_2] : memref<16x32xf32, #tpu.memory_space<vmem>>, vector<16x32xf32>
    %c0_3 = arith.constant 0 : index
    %c0_4 = arith.constant 0 : index
    %2 = vector.load %arg3[%c0_3, %c0_4] : memref<16x1xi32, #tpu.memory_space<vmem>>, vector<16x1xi32>
    %3 = tpu.iota {dimensions = array<i32: 1>} : vector<16x32xi32>
    %4 = vector.broadcast %2 : vector<16x1xi32> to vector<16x32xi32>
    %5 = arith.cmpi eq, %3, %4 : vector<16x32xi32>
    %cst = arith.constant 0.903124988 : f32
    %cst_5 = arith.constant 3.125000e-03 : f32
    %6 = vector.broadcast %cst : f32 to vector<16x32xf32>
    %7 = vector.broadcast %cst_5 : f32 to vector<16x32xf32>
    %8 = arith.select %5, %6, %7 : vector<16x32xi1>, vector<16x32xf32>
    %cst_6 = arith.constant dense<0xFF800000> : vector<16xf32>
    %9 = vector.multi_reduction <maximumf>, %0, %cst_6 [1] : vector<16x32xf32> to vector<16xf32>
    %10 = vector.shape_cast %9 : vector<16xf32> to vector<16x1xf32>
    %11 = vector.broadcast %10 : vector<16x1xf32> to vector<16x32xf32>
    %12 = arith.subf %0, %11 : vector<16x32xf32>
    %13 = math.exp %12 : vector<16x32xf32>
    %cst_7 = arith.constant dense<0.000000e+00> : vector<16xf32>
    %14 = vector.multi_reduction <add>, %13, %cst_7 [1] : vector<16x32xf32> to vector<16xf32>
    %15 = vector.shape_cast %14 : vector<16xf32> to vector<16x1xf32>
    %16 = math.log %15 : vector<16x1xf32>
    %17 = arith.addf %10, %16 : vector<16x1xf32>
    %18 = arith.mulf %0, %8 : vector<16x32xf32>
    %cst_8 = arith.constant dense<0.000000e+00> : vector<16xf32>
    %19 = vector.multi_reduction <add>, %18, %cst_8 [1] : vector<16x32xf32> to vector<16xf32>
    %20 = vector.shape_cast %19 : vector<16xf32> to vector<16x1xf32>
    %21 = arith.subf %17, %20 : vector<16x1xf32>
    %cst_9 = arith.constant 0.333333343 : f32
    %22 = vector.broadcast %cst_9 : f32 to vector<16x32xf32>
    %23 = arith.mulf %0, %22 : vector<16x32xf32>
    %cst_10 = arith.constant 0.333333343 : f32
    %24 = vector.broadcast %cst_10 : f32 to vector<16x32xf32>
    %25 = arith.mulf %1, %24 : vector<16x32xf32>
    %cst_11 = arith.constant 0.333333343 : f32
    %26 = vector.broadcast %cst_11 : f32 to vector<16x1xf32>
    %27 = arith.mulf %10, %26 : vector<16x1xf32>
    %28 = vector.broadcast %27 : vector<16x1xf32> to vector<16x32xf32>
    %29 = arith.subf %23, %28 : vector<16x32xf32>
    %30 = math.exp %29 : vector<16x32xf32>
    %cst_12 = arith.constant dense<0.000000e+00> : vector<16xf32>
    %31 = vector.multi_reduction <add>, %30, %cst_12 [1] : vector<16x32xf32> to vector<16xf32>
    %32 = vector.shape_cast %31 : vector<16xf32> to vector<16x1xf32>
    %33 = math.log %32 : vector<16x1xf32>
    %34 = arith.addf %27, %33 : vector<16x1xf32>
    %cst_13 = arith.constant dense<0xFF800000> : vector<16xf32>
    %35 = vector.multi_reduction <maximumf>, %25, %cst_13 [1] : vector<16x32xf32> to vector<16xf32>
    %36 = vector.shape_cast %35 : vector<16xf32> to vector<16x1xf32>
    %37 = vector.broadcast %36 : vector<16x1xf32> to vector<16x32xf32>
    %38 = arith.subf %25, %37 : vector<16x32xf32>
    %39 = math.exp %38 : vector<16x32xf32>
    %cst_14 = arith.constant dense<0.000000e+00> : vector<16xf32>
    %40 = vector.multi_reduction <add>, %39, %cst_14 [1] : vector<16x32xf32> to vector<16xf32>
    %41 = vector.shape_cast %40 : vector<16xf32> to vector<16x1xf32>
    %42 = math.log %41 : vector<16x1xf32>
    %43 = arith.addf %36, %42 : vector<16x1xf32>
    %44 = arith.subf %25, %23 : vector<16x32xf32>
    %45 = arith.mulf %39, %44 : vector<16x32xf32>
    %cst_15 = arith.constant dense<0.000000e+00> : vector<16xf32>
    %46 = vector.multi_reduction <add>, %45, %cst_15 [1] : vector<16x32xf32> to vector<16xf32>
    %47 = vector.shape_cast %46 : vector<16xf32> to vector<16x1xf32>
    %48 = arith.divf %47, %41 : vector<16x1xf32>
    %49 = arith.subf %48, %43 : vector<16x1xf32>
    %50 = arith.addf %49, %34 : vector<16x1xf32>
    %cst_16 = arith.constant 5.000000e-01 : f32
    %51 = vector.broadcast %cst_16 : f32 to vector<16x1xf32>
    %52 = arith.mulf %51, %21 : vector<16x1xf32>
    %cst_17 = arith.constant 5.000000e-01 : f32
    %53 = vector.broadcast %cst_17 : f32 to vector<16x1xf32>
    %54 = arith.mulf %53, %50 : vector<16x1xf32>
    %55 = arith.addf %52, %54 : vector<16x1xf32>
    %c16_i32 = arith.constant 16 : i32
    %56 = arith.muli %arg0, %c16_i32 : i32
    %57 = tpu.iota {dimensions = array<i32: 0>} : vector<16x1xi32>
    %58 = vector.broadcast %56 : i32 to vector<16x1xi32>
    %59 = arith.addi %58, %57 : vector<16x1xi32>
    %c16_i32_18 = arith.constant 16 : i32
    %60 = vector.broadcast %c16_i32_18 : i32 to vector<16x1xi32>
    %61 = arith.cmpi slt, %59, %60 : vector<16x1xi32>
    %cst_19 = arith.constant 0.000000e+00 : f32
    %62 = vector.broadcast %cst_19 : f32 to vector<16x1xf32>
    %63 = arith.select %61, %55, %62 : vector<16x1xi1>, vector<16x1xf32>
    %64 = vector.shape_cast %63 : vector<16x1xf32> to vector<1x16x1xf32>
    %cst_20 = arith.constant dense<0.000000e+00> : vector<1xf32>
    %65 = vector.multi_reduction <add>, %64, %cst_20 [1, 2] : vector<1x16x1xf32> to vector<1xf32>
    %66 = vector.shape_cast %65 : vector<1xf32> to vector<1x1x1xf32>
    %67 = vector.extract %66[0, 0, 0] : f32 from vector<1x1x1xf32>
    %cst_21 = arith.constant 0.000000e+00 : f32
    %68 = vector.broadcast %cst_21 : f32 to vector<1x8x128xf32>
    %69 = vector.broadcast %67 : f32 to vector<1x8x128xf32>
    %70 = arith.addf %68, %69 : vector<1x8x128xf32>
    %c0_22 = arith.constant 0 : index
    %c0_23 = arith.constant 0 : index
    %c0_24 = arith.constant 0 : index
    %71 = vector.load %arg4[%c0_22, %c0_23, %c0_24] : memref<1x8x128xf32, #tpu.memory_space<vmem>>, vector<1x8x128xf32>
    tpu.vector_store %arg4[%c0_22, %c0_23, %c0_24], %70 {strides = array<i32>} : memref<1x8x128xf32, #tpu.memory_space<vmem>>, vector<1x8x128xf32>,
    return
  }
  func.func @transform_0(%arg0: i32) -> (i32, i32) {
    %c0_i32 = arith.constant 0 : i32
    %c0_i32_0 = arith.constant 0 : i32
    return %arg0, %c0_i32 : i32, i32
  }
  func.func @transform_1(%arg0: i32) -> (i32, i32) {
    %c0_i32 = arith.constant 0 : i32
    %c0_i32_0 = arith.constant 0 : i32
    return %arg0, %c0_i32 : i32, i32
  }
  func.func @transform_2(%arg0: i32) -> (i32, i32) {
    %c0_i32 = arith.constant 0 : i32
    %c0_i32_0 = arith.constant 0 : i32
    return %arg0, %c0_i32 : i32, i32
  }
  func.func @transform_3(%arg0: i32) -> (i32, i32, i32) {
    %c0_i32 = arith.constant 0 : i32
    %c0_i32_0 = arith.constant 0 : i32
    %c0_i32_1 = arith.constant 0 : i32
    return %arg0, %c0_i32, %c0_i32_0 : i32, i32, i32
  }
}

</mosaic_0001>

<bundles_post_ra>
// kernel: tpu_custom_call.1
= control target key start
LH: loop header
LB: loop body
LE: loop exit
PB: predicated region body
PF: predicated region fallthrough
CT: control target
= control target key end

     0   :  { %8 = vsyncpa [#allocation3], 0  ;;  %s423_s0 = inlined_call_operand.vmem [shape: f32[16,32], index: 0, kind: input, shape index: {}]   ;;  %s424_s1 = inlined_call_operand.hbm [shape: f32[16,32], index: 1, kind: input, shape index: {}]   ;;  %s425_s2 = inlined_call_operand.vmem [shape: s32[16,1], index: 2, kind: input, shape index: {}]   ;;  %s426_s3 = inlined_call_operand.hbm [shape: f32[1,8,128], index: 3, kind: output, shape index: {}]  }
   0x1   :  { %9 = vsyncpa [#allocation4], 0  ;;  %s16_s14 = sshll.u32 %s424_s1, 4  ;;  %s316_s15 = smov [#allocation2]   ;;  %s17_s14 = int_to_ptr.hbm [resolvable:$true] %s16_s14 }
   0x2   :  { %s18_s16 = sshll.u32 %s316_s15, 4  ;;  %s317_s17 = smov 128   ;;  %s19_s16 = int_to_ptr.vmem [resolvable:$true] %s18_s16 }
   0x3   :  { %s318_s18 = smov 8  }
   0x4   :  { %24 = dma.hbm_to_vmem [thread:$0]  %s17_s14, 256, %s19_s16, [#allocation3], %s317_s17, %s317_s17, %s318_s18  }
   0x5   :  { %312 = dma.done.wait [#allocation3], 256  }
   0x6   :  { %313 = vsyncadd [#allocation3], 4294967040  ;;  %v319_v0 = vmov 0   ;;  %vm49_vm0 = vcmask 261120   ;;  %v348_v1 = vld [vmem:[%s423_s0] sm:$0xff]  ;;  %v34_v6 = vld [vmem:[#allocation2 + $0x8] sm:$0xff]  ;;  %v37_v42 = vlaneseq }
   0x7   :  { %234 = vset.pattern.permute.xlu2 %v319_v0  ;;  %235 = vset.pattern.permute.xlu0 %v319_v0  ;;  %v33_v2 = vld [vmem:[#allocation2] sm:$0xff]  ;;  %v50_v3 = vsel %vm49_vm0, %v348_v1, -inf  ;;  %v359_v8 = vld [vmem:[%s423_s0 + $0x8] sm:$0xff]  ;;  %v361_v9 = vmul.f32 0.33333334, %v34_v6  ;;  %vm193_vm11 = vcmask 7168  }
   0x8   :  { %v86_v4 = vmul.f32 0.33333334, %v33_v2  ;;  %v35_v5 = vld [vmem:[%s425_s2] sm:$0xff]  ;;  %51 = vmax.xlane.f32.xlu1 %v50_v3  ;;  %v53_v10 = vsel %vm49_vm0, %v359_v8, -inf  ;;  %v36_v11 = vld [vmem:[%s425_s2 + $0x8] sm:$0xff]  ;;  %v38_v47 = vand.u32 127, %v37_v42 }
   0x9   :  { %40 = vperm.xlu2 %234, %v35_v5   ;;  %v111_v12 = vsel %vm49_vm0, %v361_v9, -inf  ;;  %v84_v19 = vmul.f32 0.33333334, %v348_v1  ;;  %v85_v30 = vmul.f32 0.33333334, %v359_v8  ;;  %s216_s26 = sshll.u32 %s426_s3, 4  ;;  %s217_s26 = int_to_ptr.hbm [resolvable:$true] %s216_s26 }
   0xa   :  { %v108_v7 = vsel %vm49_vm0, %v86_v4, -inf  ;;  %v320_v53 = vmov 0.003125   ;;  %s321_s27 = smov [#allocation5]  }
   0xb   :  { %109 = vmax.xlane.f32.xlu0 %v108_v7  ;;  %v132_v45 = vsub.f32 %v86_v4, %v84_v19  ;;  %v133_v50 = vsub.f32 %v361_v9, %v85_v30  ;;  %s214_s28 = sshll.u32 %s321_s27, 4  ;;  %s215_s28 = int_to_ptr.vmem [resolvable:$true] %s214_s28 }
  0x10   :  { %54 = vmax.xlane.f32.xlu1 %v53_v10 }
  0x11   :  { %43 = vperm.xlu2 %234, %v36_v11  }
  0x13   :  { %112 = vmax.xlane.f32.xlu0 %v111_v12 }
  0x63   :  { %v41_v43 = vpop.permute.xlu2 %40 }
  0x64   :  { %vm45_vm1 = vcmp.eq.s32.totalorder %v38_v47, %v41_v43 }
  0x65   :  { %v47_v54 = vsel %vm45_vm1, 0.903125, %v320_v53 }
  0x66   :  { %v74_v56 = vmul.f32 %v47_v54, %v348_v1 }
  0x68   :  { %v76_v59 = vsel %vm49_vm0, %v74_v56, 0.0 }
  0x6b   :  { %v44_v51 = vpop.permute.xlu2 %43 }
  0x6c   :  { %vm46_vm2 = vcmp.eq.s32.totalorder %v38_v47, %v44_v51 }
  0x6d   :  { %v48_v58 = vsel %vm46_vm2, 0.903125, %v320_v53 }
  0x6e   :  { %v75_v60 = vmul.f32 %v48_v58, %v359_v8 }
  0x70   :  { %v79_v61 = vsel %vm49_vm0, %v75_v60, 0.0 }
  0x7b   :  { %v370_v13 = vpop.xlane.xlu1 %51 }
  0x7c   :  { %v56_v14 = vsub.f32 %v348_v1, %v370_v13  ;;  %v382_v20 = vmul.f32 0.33333334, %v370_v13 }
  0x7e   :  { %v374_v15 = vpop.xlane.xlu0 %109  ;;  %v58_v16 = vmul.f32 1.442695, %v56_v14  ;;  %v90_v28 = vsub.f32 %v84_v19, %v382_v20 }
  0x7f   :  { %v114_v23 = vsub.f32 %v86_v4, %v374_v15 }
  0x80   :  { %236 = vpow2.f32 %v58_v16  ;;  %v92_v32 = vmul.f32 1.442695, %v90_v28 }
  0x81   :  { %v116_v29 = vmul.f32 1.442695, %v114_v23 }
  0x83   :  { %v376_v17 = vpop.xlane.xlu1 %54 }
  0x84   :  { %v57_v18 = vsub.f32 %v359_v8, %v376_v17  ;;  %v393_v31 = vmul.f32 0.33333334, %v376_v17 }
  0x86   :  { %v384_v21 = vpop.xlane.xlu0 %112  ;;  %v237_v22 = vpop.eup %236  ;;  %v60_v24 = vmul.f32 1.442695, %v57_v18  ;;  %v91_v34 = vsub.f32 %v85_v30, %v393_v31 }
  0x87   :  { %v115_v25 = vsub.f32 %v361_v9, %v384_v21  ;;  %v62_v26 = vsel %vm49_vm0, %v237_v22, 0.0 }
  0x88   :  { %238 = vpow2.f32 %v60_v24  ;;  %63 = vadd.xlane.f32.xlu2 %v62_v26  ;;  %v94_v37 = vmul.f32 1.442695, %v91_v34 }
  0x89   :  { %v118_v27 = vmul.f32 1.442695, %v115_v25 }
  0x8b   :  { %240 = vpow2.f32 %v118_v27 }
  0x8c   :  { %242 = vpow2.f32 %v116_v29 }
  0x8d   :  { %244 = vpow2.f32 %v92_v32 }
  0x8e   :  { %v239_v33 = vpop.eup %238  ;;  %246 = vpow2.f32 %v94_v37 }
  0x8f   :  { %v65_v35 = vsel %vm49_vm0, %v239_v33, 0.0 }
  0x90   :  { %66 = vadd.xlane.f32.xlu0 %v65_v35 }
  0x91   :  { %v241_v36 = vpop.eup %240 }
  0x92   :  { %v123_v38 = vsel %vm49_vm0, %v241_v36, 0.0  ;;  %v243_v39 = vpop.eup %242  ;;  %v135_v55 = vmul.f32 %v241_v36, %v133_v50 }
  0x93   :  { %124 = vadd.xlane.f32.xlu1 %v123_v38  ;;  %v245_v40 = vpop.eup %244  ;;  %v120_v41 = vsel %vm49_vm0, %v243_v39, 0.0  ;;  %v134_v48 = vmul.f32 %v243_v39, %v132_v45 }
  0x94   :  { %v96_v44 = vsel %vm49_vm0, %v245_v40, 0.0  ;;  %v247_v46 = vpop.eup %246  ;;  %v139_v57 = vsel %vm49_vm0, %v135_v55, 0.0 }
  0x95   :  { %v99_v49 = vsel %vm49_vm0, %v247_v46, 0.0  ;;  %v136_v52 = vsel %vm49_vm0, %v134_v48, 0.0 }
  0x98   :  { %121 = vadd.xlane.f32.xlu0 %v120_v41 }
  0x9b   :  { %97 = vadd.xlane.f32.xlu1 %v96_v44 }
  0xa0   :  { %100 = vadd.xlane.f32.xlu0 %v99_v49 }
  0xa3   :  { %137 = vadd.xlane.f32.xlu1 %v136_v52 }
  0xa8   :  { %140 = vadd.xlane.f32.xlu0 %v139_v57 }
  0xab   :  { %77 = vadd.xlane.f32.xlu1 %v76_v59 }
  0xb0   :  { %80 = vadd.xlane.f32.xlu0 %v79_v61 }
  0xfb   :  { %v64_v3 = vpop.xlane.xlu2 %63 }
 0x103   :  { %v67_v62 = vpop.xlane.xlu0 %66 }
 0x106   :  { %v125_v63 = vpop.xlane.xlu1 %124 }
 0x107   :  { %248 = vrcp.f32 %v125_v63  ;;  %vm162_vm3 = vweird.f32 %v125_v63  ;;  %v168_v14 = vand.u32 2147483648, %v125_v63  ;;  %v166_v23 = vand.u32 2147483647, %v125_v63 }
 0x109   :  { %v169_v33 = vor.u32 1.1754944e-38, %v168_v14  ;;  %vm167_vm10 = vcmp.eq.f32.partialorder %v166_v23, 8.507059e+37 }
 0x10b   :  { %v122_v0 = vpop.xlane.xlu0 %121 }
 0x10c   :  { %250 = vrcp.f32 %v122_v0  ;;  %v151_v18 = vand.u32 2147483647, %v122_v0  ;;  %v153_v19 = vand.u32 2147483648, %v122_v0  ;;  %vm147_vm7 = vweird.f32 %v122_v0 }
 0x10d   :  { %v249_v2 = vpop.eup %248  ;;  %252 = vlog2.f32 %v125_v63 }
 0x10e   :  { %v158_v1 = vmul.f32 %v249_v2, %v125_v63  ;;  %v98_v4 = vpop.xlane.xlu1 %97  ;;  %254 = vlog2.f32 %v122_v0  ;;  %vm163_vm4 = vweird.f32 %v249_v2  ;;  %vm152_vm9 = vcmp.eq.f32.partialorder %v151_v18, 8.507059e+37 }
 0x10f   :  { %256 = vlog2.f32 %v64_v3  ;;  %vm408_vm6 = vmor %vm162_vm3, %vm163_vm4  ;;  %v154_v36 = vor.u32 1.1754944e-38, %v153_v19 }
 0x110   :  { %v159_v5 = vsub.f32 1.0, %v158_v1  ;;  %258 = vlog2.f32 %v98_v4 }
 0x112   :  { %v251_v6 = vpop.eup %250  ;;  %v160_v7 = vmul.f32 %v249_v2, %v159_v5 }
 0x113   :  { %v143_v8 = vmul.f32 %v251_v6, %v122_v0  ;;  %v101_v9 = vpop.xlane.xlu0 %100  ;;  %v253_v11 = vpop.eup %252  ;;  %vm148_vm5 = vweird.f32 %v251_v6 }
 0x114   :  { %260 = vlog2.f32 %v101_v9  ;;  %v161_v10 = vadd.f32 %v249_v2, %v160_v7  ;;  %v255_v16 = vpop.eup %254  ;;  %v129_v28 = vmul.f32 0.6931472, %v253_v11  ;;  %vm149_vm8 = vmor %vm147_vm7, %vm148_vm5 }
 0x115   :  { %262 = vlog2.f32 %v67_v62  ;;  %v144_v12 = vsub.f32 1.0, %v143_v8  ;;  %v257_v24 = vpop.eup %256  ;;  %v127_v30 = vmul.f32 0.6931472, %v255_v16 }
 0x116   :  { %v138_v22 = vpop.xlane.xlu1 %137  ;;  %v259_v27 = vpop.eup %258  ;;  %v165_v29 = vsel %vm408_vm6, %v249_v2, %v161_v10  ;;  %v69_v35 = vmul.f32 0.6931472, %v257_v24  ;;  %v131_v44 = vadd.f32 %v129_v28, %v384_v21 }
 0x117   :  { %v145_v25 = vmul.f32 %v251_v6, %v144_v12  ;;  %v103_v38 = vmul.f32 0.6931472, %v259_v27  ;;  %v170_v42 = vsel %vm167_vm10, %v169_v33, %v165_v29  ;;  %v130_v46 = vadd.f32 %v127_v30, %v374_v15 }
 0x118   :  { %v72_v51 = vadd.f32 %v69_v35, %v370_v13 }
 0x119   :  { %v146_v32 = vadd.f32 %v251_v6, %v145_v25  ;;  %v106_v53 = vadd.f32 %v103_v38, %v382_v20 }
 0x11a   :  { %v261_v34 = vpop.eup %260 }
 0x11b   :  { %v263_v37 = vpop.eup %262  ;;  %v105_v39 = vmul.f32 0.6931472, %v261_v34  ;;  %v150_v40 = vsel %vm149_vm8, %v251_v6, %v146_v32  ;;  %v141_v41 = vpop.xlane.xlu0 %140 }
 0x11c   :  { %v155_v43 = vsel %vm152_vm9, %v154_v36, %v150_v40  ;;  %v171_v45 = vmul.f32 %v170_v42, %v141_v41  ;;  %v71_v48 = vmul.f32 0.6931472, %v263_v37 }
 0x11d   :  { %v156_v47 = vmul.f32 %v155_v43, %v138_v22  ;;  %v107_v49 = vadd.f32 %v105_v39, %v393_v31 }
 0x11e   :  { %v173_v50 = vsub.f32 %v171_v45, %v131_v44  ;;  %v78_v52 = vpop.xlane.xlu1 %77  ;;  %v73_v58 = vadd.f32 %v71_v48, %v376_v17 }
 0x11f   :  { %v172_v54 = vsub.f32 %v156_v47, %v130_v46  ;;  %v82_v55 = vsub.f32 %v72_v51, %v78_v52 }
 0x120   :  { %v175_v57 = vadd.f32 %v173_v50, %v107_v49 }
 0x121   :  { %v174_v56 = vadd.f32 %v172_v54, %v106_v53  ;;  %v176_v60 = vmul.f32 0.5, %v82_v55 }
 0x122   :  { %v179_v63 = vmul.f32 0.5, %v175_v57 }
 0x123   :  { %v178_v21 = vmul.f32 0.5, %v174_v56  ;;  %v81_v59 = vpop.xlane.xlu0 %80 }
 0x124   :  { %v83_v15 = vsub.f32 %v73_v58, %v81_v59 }
 0x125   :  { %v180_v61 = vadd.f32 %v178_v21, %v176_v60 }
 0x126   :  { %v177_v62 = vmul.f32 0.5, %v83_v15 }
 0x127   :  { %v194_v0 = vsel %vm193_vm11, %v180_v61, 0.0 }
 0x128   :  { %v181_v31 = vadd.f32 %v179_v63, %v177_v62 }
 0x12a   :  { %v195_v13 = vsel %vm193_vm11, %v181_v31, 0.0 }
 0x12b   :  { %v196_v2 = vadd.f32 %v195_v13, %v194_v0 }
 0x12d   :  { %197 = vadd.xlane.f32.xlu1 %v196_v2 }
 0x1a0   :  { %v198_v20 = vpop.xlane.xlu1 %197 }
 0x1a1   :  { %v199_v3 = vrot.slane %v198_v20, 4 }
 0x1a3   :  { %v200_v1 = vadd.f32 %v199_v3, %v198_v20 }
 0x1a5   :  { %v201_v4 = vrot.slane %v200_v1, 2 }
 0x1a7   :  { %v202_v5 = vadd.f32 %v201_v4, %v200_v1 }
 0x1a9   :  { %v203_v6 = vrot.slane %v202_v5, 1 }
 0x1ab   :  { %v204_v17 = vadd.f32 %v203_v6, %v202_v5 }
 0x1ad   :  { %226 = vpush %v204_v17 }
 0x1de   :  { %s227_s29 = spop %226 }
 0x1df   :  { %v206_v7 = vstv %s227_s29 }
 0x1e0   :  { %208 = vst [vmem:[#allocation5] sm:$0xff] %v206_v7 }
 0x1e1   :  { %219 = dma.vmem_to_hbm [thread:$0]  %s215_s28, 128, %s217_s26, [#allocation4]  }
 0x1e2   :  { %314 = dma.done.wait [#allocation4], 128  }
 0x1e3   :  { %315 = vsyncadd [#allocation4], 4294967168 }
 0x1e4   :  { %224 = vsyncpa [#allocation3], 1 }
 0x1e5   :  { %225 = vsyncpa [#allocation4], 1 }

</bundles_post_ra>
